<compile_context>
chip_gen: v7x
topology: tpu7x:2x2x1
jax: 0.10.0
libtpu: 0.0.40
codegen_flags: <defaults>
</compile_context>

<pallas_src>
import jax
import jax.numpy as jnp
from jax.experimental import pallas as pl
from jax.experimental.pallas import tpu as pltpu

NEG_SLOPE = 0.01  # torch default for LeakyReLU / F.leaky_relu


def _round_up(x, m):
    return ((x + m - 1) // m) * m


def _cdiv(a, b):
    return (a + b - 1) // b


def _sublane_multiple(dtype):
    # 8 sublanes for 4-byte, 16 for 2-byte, 32 for 1-byte dtypes.
    return max(8, 32 // jnp.dtype(dtype).itemsize)


def _vmem_capacity_bytes():
    try:
        cap = int(pltpu.get_tpu_info().vmem_capacity_bytes)
        if cap > 0:
            return cap
    except Exception:
        pass
    return 64 * 1024 * 1024  # conservative (v7x-sized) fallback


# ---------------------------------------------------------------------------
# One-time parameter packing.
# ---------------------------------------------------------------------------
def prepare_params(w_cvx, b_cvx, w_ccv, b_ccv, compute_dtype=None):
    """Pack/clamp/scale/pad the MonoNonLinear parameters ONCE (do at init)."""
    f_out, f_in = w_cvx.shape
    if compute_dtype is None:
        compute_dtype = w_cvx.dtype
    compute_dtype = jnp.dtype(compute_dtype)
    f_out_p = _round_up(f_out, 128)
    # Folds both the /(2*F_in) and the final 0.5 (exact: positive homogeneity).
    scale = 1.0 / (4.0 * f_in)

    def pack_w(w):
        wt = (jnp.maximum(w, 0.0) * scale).astype(jnp.float32).T   # (F_in, F_out)
        return jnp.pad(wt, ((0, 0), (0, f_out_p - f_out)))

    def pack_b(b):
        return jnp.pad(b.astype(jnp.float32) * scale, (0, f_out_p - f_out))

    w_packed = jnp.stack([pack_w(w_cvx), pack_w(w_ccv)]).astype(compute_dtype)  # (2, F_in, F_out_p)
    b_packed = jnp.stack([pack_b(b_cvx), pack_b(b_ccv)])[:, None, :]            # (2, 1, F_out_p) f32

    return dict(w=w_packed, b=b_packed, f_in=int(f_in), f_out=int(f_out),
                f_out_p=int(f_out_p), compute_dtype=compute_dtype)


# ---------------------------------------------------------------------------
# Kernel body.
# ---------------------------------------------------------------------------
def _make_kernel(tn, store_cols, k_tiles):
    def _epilogue(z_cvx, z_ccv, b_ref, o_ref):
        z_cvx = z_cvx + b_ref[0]                                       # (tb, tn) + (1, tn)
        z_ccv = z_ccv + b_ref[1]
        lr_cvx = jnp.where(z_cvx >= 0.0, z_cvx, NEG_SLOPE * z_cvx)     # leaky_relu(z_cvx)
        lr_ccv_neg = jnp.where(z_ccv <= 0.0, -z_ccv, NEG_SLOPE * (-z_ccv))  # leaky_relu(-z_ccv)
        out = lr_cvx - lr_ccv_neg                                      # = 0.5*(convex + concave)
        o_ref[...] = out[:, :store_cols].astype(o_ref.dtype)

    if k_tiles == 1:
        # Common (small-layer) path: no accumulator scratch, direct epilogue.
        def kernel(x_ref, w_ref, b_ref, o_ref):
            x = x_ref[...]
            z_cvx = jnp.dot(x, w_ref[0], preferred_element_type=jnp.float32)
            z_ccv = jnp.dot(x, w_ref[1], preferred_element_type=jnp.float32)
            _epilogue(z_cvx, z_ccv, b_ref, o_ref)
        return kernel

    def kernel(x_ref, w_ref, b_ref, o_ref, acc_cvx, acc_ccv):
        k = pl.program_id(2)

        @pl.when(k == 0)
        def _():
            acc_cvx[...] = jnp.zeros_like(acc_cvx)
            acc_ccv[...] = jnp.zeros_like(acc_ccv)

        x = x_ref[...]
        acc_cvx[...] += jnp.dot(x, w_ref[0], preferred_element_type=jnp.float32)
        acc_ccv[...] += jnp.dot(x, w_ref[1], preferred_element_type=jnp.float32)

        @pl.when(k == pl.num_programs(2) - 1)
        def _():
            _epilogue(acc_cvx[...], acc_ccv[...], b_ref, o_ref)

    return kernel


# ---------------------------------------------------------------------------
# Tiling heuristics.
# ---------------------------------------------------------------------------
def _vmem_estimate(tb, tn, tk, k_tiles, out_block_cols, x_itemsize, w_itemsize,
                   out_itemsize):
    # Conservative: weights/bias counted double-buffered even when we request
    # pl.Buffered(1) for the resident case (extra headroom, never OOM).
    total = (2 * tb * tk * x_itemsize                    # x tiles (double buffered)
             + 2 * tb * out_block_cols * out_itemsize    # out tiles (double buffered)
             + 2 * 2 * tk * tn * w_itemsize              # convex+concave weight tiles
             + 2 * 2 * tn * 4)                           # bias (f32)
    if k_tiles > 1:
        total += 2 * tb * tn * 4                         # f32 accumulators
    return total


def _choose_tiles(b_rows, f_in, f_out, f_out_p, sub, x_itemsize, w_itemsize,
                  out_itemsize, budget):
    tb_max = min(1024, _round_up(b_rows, sub))
    tb_cands = []
    t = tb_max
    while True:
        tb_cands.append(t)
        if t <= sub:
            break
        t = max(sub, ((t // 2) // sub) * sub)

    tn_cands = [f_out_p] + [t for t in (512, 256, 128)
                            if t < f_out_p and f_out_p % t == 0]
    tk_cands = [f_in] + [t for t in (2048, 1024, 512, 256, 128)
                         if t < f_in and f_in % t == 0]

    def out_cols(tn):
        if tn < f_out_p:
            return tn                                    # N-tiled: lane-dense padded
        return f_out_p if f_out >= 64 else f_out         # unpadded writeback if small

    def fits(tb_, tn_, tk_):
        return _vmem_estimate(tb_, tn_, tk_, f_in // tk_, out_cols(tn_),
                              x_itemsize, w_itemsize, out_itemsize) <= budget

    def search(tb_list):
        # Prefer resident weights (no K/N tiling), then N-tiling, then K-tiling;
        # within each, prefer the largest row tile.
        for tk_ in tk_cands:
            for tn_ in tn_cands:
                for tb_ in tb_list:
                    if fits(tb_, tn_, tk_):
                        return tb_, tn_, tk_
        return None

    cfg = search([t for t in tb_cands if t >= min(256, tb_max)])
    if cfg is None:
        cfg = search(tb_cands)
    if cfg is None:
        cfg = (tb_cands[-1], tn_cands[-1], tk_cands[-1])
    return cfg


# ---------------------------------------------------------------------------
# Forward pass.
# ---------------------------------------------------------------------------
def mono_nonlinear_prepared(x, params, *, tile_override=None, interpret=False):
    w_packed = params["w"]
    b_packed = params["b"]
    f_in, f_out, f_out_p = params["f_in"], params["f_out"], params["f_out_p"]
    compute_dtype = params["compute_dtype"]

    orig_shape = x.shape
    if x.ndim != 2:
        x = x.reshape(-1, orig_shape[-1])
    b_rows, xf = x.shape
    assert xf == f_in, f"x has {xf} features, params expect {f_in}"

    out_dtype = x.dtype
    if x.dtype != compute_dtype:
        x = x.astype(compute_dtype)  # single activation cast (optional bf16 MXU path)

    x_itemsize = jnp.dtype(compute_dtype).itemsize
    w_itemsize = jnp.dtype(w_packed.dtype).itemsize
    out_itemsize = jnp.dtype(out_dtype).itemsize
    sub = _sublane_multiple(compute_dtype)

    vmem_cap = _vmem_capacity_bytes()
    budget = int(0.70 * vmem_cap)
    vmem_limit = int(min(0.85 * vmem_cap, budget + (16 << 20)))

    if tile_override is not None:
        tb, tn, tk = tile_override
        assert tb % sub == 0 and tb > 0
        assert f_out_p % tn == 0 and (tn % 128 == 0 or tn == f_out_p)
        assert f_in % tk == 0 and (tk % 128 == 0 or tk == f_in)
    else:
        tb, tn, tk = _choose_tiles(b_rows, f_in, f_out, f_out_p, sub,
                                   x_itemsize, w_itemsize, out_itemsize, budget)

    n_tiles = f_out_p // tn
    k_tiles = f_in // tk

    # Guarantee >=2 parallel grid steps so v7x megacore sharding has work.
    if tile_override is None and n_tiles == 1 and b_rows >= 2 * sub:
        if _cdiv(b_rows, tb) < 2:
            tb = _round_up(_cdiv(b_rows, 2), sub)

    b_pad = _round_up(b_rows, tb)
    if b_pad != b_rows:
        x = jnp.pad(x, ((0, b_pad - b_rows), (0, 0)))
    bt = b_pad // tb
    grid = (bt, n_tiles, k_tiles)

    if n_tiles > 1:
        out_cols, out_block_cols, store_cols = f_out_p, tn, tn
    else:
        out_cols = f_out_p if f_out >= 64 else f_out    # unpadded store for small F_out
        out_block_cols = store_cols = out_cols

    kernel = _make_kernel(tn, store_cols, k_tiles)
    out_shape = jax.ShapeDtypeStruct((b_pad, out_cols), out_dtype)

    x_spec = pl.BlockSpec((tb, tk), lambda i, j, k: (i, k))
    out_spec = pl.BlockSpec((tb, out_block_cols), lambda i, j, k: (i, j))

    w_resident = (n_tiles == 1 and k_tiles == 1)
    b_resident = (n_tiles == 1)

    scratch_shapes = []
    if k_tiles > 1:
        scratch_shapes = [pltpu.VMEM((tb, tn), jnp.float32),
                          pltpu.VMEM((tb, tn), jnp.float32)]

    def run(use_single_buffer):
        def spec(shape, index_map, resident):
            if resident and use_single_buffer:
                return pl.BlockSpec(shape, index_map, pipeline_mode=pl.Buffered(1))
            return pl.BlockSpec(shape, index_map)

        w_spec = spec((2, tk, tn), lambda i, j, k: (0, k, j), w_resident)
        b_spec = spec((2, 1, tn), lambda i, j, k: (0, 0, j), b_resident)

        return pl.pallas_call(
            kernel,
            out_shape=out_shape,
            grid=grid,
            in_specs=[x_spec, w_spec, b_spec],
            out_specs=out_spec,
            scratch_shapes=scratch_shapes,
            compiler_params=pltpu.CompilerParams(
                dimension_semantics=("parallel", "parallel", "arbitrary"),
                vmem_limit_bytes=vmem_limit,
            ),
            interpret=interpret,
        )(x, w_packed, b_packed)

    if w_resident or b_resident:
        try:
            out_p = run(True)            # single-buffered resident weights/bias
        except Exception:
            out_p = run(False)           # pipeline_mode unavailable -> default buffering
    else:
        out_p = run(False)

    out = out_p
    if out_cols != f_out:
        out = out[:, :f_out]
    if b_pad != b_rows:
        out = out[:b_rows]
    if len(orig_shape) != 2:
        out = out.reshape(*orig_shape[:-1], f_out)
    return out


def mono_nonlinear(x, w_cvx, b_cvx, w_ccv, b_ccv, compute_dtype=None):
    """Convenience wrapper.  NOTE: re-packs the weights every call; prefer
    prepare_params() once + mono_nonlinear_prepared() in hot loops."""
    params = prepare_params(w_cvx, b_cvx, w_ccv, b_ccv, compute_dtype)
    return mono_nonlinear_prepared(x, params)


# ---------------------------------------------------------------------------
# Pure-JAX reference mirroring the PyTorch module exactly.
# ---------------------------------------------------------------------------
def reference(x, w_cvx, b_cvx, w_ccv, b_ccv):
    in_features = x.shape[-1]

    def mono_linear(x, w, b):
        return (x @ jnp.maximum(w, 0.0).T + b) / (2.0 * in_features)

    def leaky(v):
        return jnp.where(v >= 0, v, NEG_SLOPE * v)

    convex = leaky(mono_linear(x, w_cvx, b_cvx))
    concave = -leaky(-mono_linear(x, w_ccv, b_ccv))
    return 0.5 * (concave + convex)


if __name__ == "__main__":
    key = jax.random.PRNGKey(0)
    k_x, k_wc, k_wv, k_x2, k_wc2, k_wv2 = jax.random.split(key, 6)

    # ---- Case 1: typical small HEBO layer (resident weights, unpadded out) ----
    B, F_in, F_out = 16, 32, 16
    x = jax.random.normal(k_x, (B, F_in), dtype=jnp.float32)
    # Parameter init per MonoLinear.__init__: randn(out, in) + 2, bias = zeros.
    w_cvx = jax.random.normal(k_wv, (F_out, F_in), dtype=jnp.float32) + 2.0
    b_cvx = jnp.zeros((F_out,), dtype=jnp.float32)
    w_ccv = jax.random.normal(k_wc, (F_out, F_in), dtype=jnp.float32) + 2.0
    b_ccv = jnp.zeros((F_out,), dtype=jnp.float32)

    params = prepare_params(w_cvx, b_cvx, w_ccv, b_ccv)
    out = jax.block_until_ready(mono_nonlinear_prepared(x, params))
    ref = reference(x, w_cvx, b_cvx, w_ccv, b_ccv)
    assert out.shape == (B, F_out)
    assert jnp.allclose(out, ref, atol=1e-4, rtol=1e-4), "case 1 mismatch vs reference"

    # ---- Case 2: force the N/K-tiled accumulator path (padded output, row pad) ----
    B2, F_in2, F_out2 = 20, 256, 192
    x2 = jax.random.normal(k_x2, (B2, F_in2), dtype=jnp.float32)
    w_cvx2 = jax.random.normal(k_wv2, (F_out2, F_in2), dtype=jnp.float32) + 2.0
    b_cvx2 = 0.1 * jax.random.normal(k_wc2, (F_out2,), dtype=jnp.float32)
    w_ccv2 = jax.random.normal(k_wc2, (F_out2, F_in2), dtype=jnp.float32) + 2.0
    b_ccv2 = 0.1 * jax.random.normal(k_wv2, (F_out2,), dtype=jnp.float32)

    params2 = prepare_params(w_cvx2, b_cvx2, w_ccv2, b_ccv2)
    out2 = jax.block_until_ready(
        mono_nonlinear_prepared(x2, params2, tile_override=(8, 128, 128)))
    ref2 = reference(x2, w_cvx2, b_cvx2, w_ccv2, b_ccv2)
    assert out2.shape == (B2, F_out2)
    assert jnp.allclose(out2, ref2, atol=1e-4, rtol=1e-4), "case 2 mismatch vs reference"

    print("KERNEL_OK")
</pallas_src>

<mosaic_0001>
module attributes {stable_mosaic.version = 11 : i64} {
  func.func @kernel(%arg0: i32, %arg1: i32, %arg2: i32, %arg3: memref<8x32xf32, #tpu.memory_space<vmem>>, %arg4: memref<2x32x128xf32, #tpu.memory_space<vmem>>, %arg5: memref<2x1x128xf32, #tpu.memory_space<vmem>>, %arg6: memref<8x16xf32, #tpu.memory_space<vmem>>) attributes {dimension_semantics = [#tpu.dimension_semantics<parallel>, #tpu.dimension_semantics<parallel>, #tpu.dimension_semantics<arbitrary>], iteration_bounds = array<i64: 2, 1, 1>, scalar_prefetch = 0 : i64, scratch_operands = 0 : i64, tpu.core_type = #tpu.core_type<tc>, window_params = [{transform_indices = @transform_0, window_bounds = array<i64: 8, 32>}, {pipeline_mode = #tpu.pipeline_mode<synchronous>, transform_indices = @transform_1, window_bounds = array<i64: 2, 32, 128>}, {pipeline_mode = #tpu.pipeline_mode<synchronous>, transform_indices = @transform_2, window_bounds = array<i64: 2, 1, 128>}, {transform_indices = @transform_3, window_bounds = array<i64: 8, 16>}]} {
    %c0 = arith.constant 0 : index
    %c0_0 = arith.constant 0 : index
    %0 = vector.load %arg3[%c0, %c0_0] : memref<8x32xf32, #tpu.memory_space<vmem>>, vector<8x32xf32>
    %c0_1 = arith.constant 0 : index
    %c0_2 = arith.constant 0 : index
    %c0_3 = arith.constant 0 : index
    %1 = vector.load %arg4[%c0_1, %c0_2, %c0_3] : memref<2x32x128xf32, #tpu.memory_space<vmem>>, vector<1x32x128xf32>
    %2 = vector.shape_cast %1 : vector<1x32x128xf32> to vector<32x128xf32>
    %cst = arith.constant dense<0.000000e+00> : vector<8x128xf32>
    %3 = tpu.matmul %0, %2, %cst {dimension_numbers = #tpu.dot_dimension_numbers<[1], [0], [0], [1], [0, 0, 1, 1], [], []>} : vector<8x32xf32>, vector<32x128xf32>, vector<8x128xf32> -> vector<8x128xf32>
    %c1 = arith.constant 1 : index
    %c0_4 = arith.constant 0 : index
    %c0_5 = arith.constant 0 : index
    %4 = vector.load %arg4[%c1, %c0_4, %c0_5] : memref<2x32x128xf32, #tpu.memory_space<vmem>>, vector<1x32x128xf32>
    %5 = vector.shape_cast %4 : vector<1x32x128xf32> to vector<32x128xf32>
    %cst_6 = arith.constant dense<0.000000e+00> : vector<8x128xf32>
    %6 = tpu.matmul %0, %5, %cst_6 {dimension_numbers = #tpu.dot_dimension_numbers<[1], [0], [0], [1], [0, 0, 1, 1], [], []>} : vector<8x32xf32>, vector<32x128xf32>, vector<8x128xf32> -> vector<8x128xf32>
    %c0_7 = arith.constant 0 : index
    %c0_8 = arith.constant 0 : index
    %c0_9 = arith.constant 0 : index
    %7 = vector.load %arg5[%c0_7, %c0_8, %c0_9] : memref<2x1x128xf32, #tpu.memory_space<vmem>>, vector<1x1x128xf32>
    %8 = vector.shape_cast %7 : vector<1x1x128xf32> to vector<1x128xf32>
    %9 = vector.broadcast %8 : vector<1x128xf32> to vector<8x128xf32>
    %10 = arith.addf %3, %9 : vector<8x128xf32>
    %c1_10 = arith.constant 1 : index
    %c0_11 = arith.constant 0 : index
    %c0_12 = arith.constant 0 : index
    %11 = vector.load %arg5[%c1_10, %c0_11, %c0_12] : memref<2x1x128xf32, #tpu.memory_space<vmem>>, vector<1x1x128xf32>
    %12 = vector.shape_cast %11 : vector<1x1x128xf32> to vector<1x128xf32>
    %13 = vector.broadcast %12 : vector<1x128xf32> to vector<8x128xf32>
    %14 = arith.addf %6, %13 : vector<8x128xf32>
    %cst_13 = arith.constant 0.000000e+00 : f32
    %15 = vector.broadcast %cst_13 : f32 to vector<8x128xf32>
    %16 = arith.cmpf oge, %10, %15 : vector<8x128xf32>
    %cst_14 = arith.constant 0.00999999977 : f32
    %17 = vector.broadcast %cst_14 : f32 to vector<8x128xf32>
    %18 = arith.mulf %17, %10 : vector<8x128xf32>
    %19 = arith.select %16, %10, %18 : vector<8x128xi1>, vector<8x128xf32>
    %cst_15 = arith.constant 0.000000e+00 : f32
    %20 = vector.broadcast %cst_15 : f32 to vector<8x128xf32>
    %21 = arith.cmpf ole, %14, %20 : vector<8x128xf32>
    %cst_16 = arith.constant 0.000000e+00 : f32
    %22 = vector.broadcast %cst_16 : f32 to vector<8x128xf32>
    %23 = arith.subf %22, %14 : vector<8x128xf32>
    %cst_17 = arith.constant 0.000000e+00 : f32
    %24 = vector.broadcast %cst_17 : f32 to vector<8x128xf32>
    %25 = arith.subf %24, %14 : vector<8x128xf32>
    %cst_18 = arith.constant 0.00999999977 : f32
    %26 = vector.broadcast %cst_18 : f32 to vector<8x128xf32>
    %27 = arith.mulf %26, %25 : vector<8x128xf32>
    %28 = arith.select %21, %23, %27 : vector<8x128xi1>, vector<8x128xf32>
    %29 = arith.subf %19, %28 : vector<8x128xf32>
    %30 = vector.extract_strided_slice %29 {offsets = [0, 0], sizes = [8, 16], strides = [1, 1]} : vector<8x128xf32> to vector<8x16xf32>
    %c0_19 = arith.constant 0 : index
    %c0_20 = arith.constant 0 : index
    %31 = vector.load %arg6[%c0_19, %c0_20] : memref<8x16xf32, #tpu.memory_space<vmem>>, vector<8x16xf32>
    tpu.vector_store %arg6[%c0_19, %c0_20], %30 {strides = array<i32>} : memref<8x16xf32, #tpu.memory_space<vmem>>, vector<8x16xf32>,
    return
  }
  func.func @transform_0(%arg0: i32, %arg1: i32, %arg2: i32) -> (i32, i32) {
    %c0_i32 = arith.constant 0 : i32
    return %arg0, %arg2 : i32, i32
  }
  func.func @transform_1(%arg0: i32, %arg1: i32, %arg2: i32) -> (i32, i32, i32) {
    %c0_i32 = arith.constant 0 : i32
    %c0_i32_0 = arith.constant 0 : i32
    return %c0_i32, %arg2, %arg1 : i32, i32, i32
  }
  func.func @transform_2(%arg0: i32, %arg1: i32, %arg2: i32) -> (i32, i32, i32) {
    %c0_i32 = arith.constant 0 : i32
    %c0_i32_0 = arith.constant 0 : i32
    %c0_i32_1 = arith.constant 0 : i32
    return %c0_i32, %c0_i32_0, %arg1 : i32, i32, i32
  }
  func.func @transform_3(%arg0: i32, %arg1: i32, %arg2: i32) -> (i32, i32) {
    %c0_i32 = arith.constant 0 : i32
    return %arg0, %arg1 : i32, i32
  }
}

module attributes {stable_mosaic.version = 11 : i64} {
  func.func @kernel(%arg0: i32, %arg1: i32, %arg2: i32, %arg3: memref<8x32xf32, #tpu.memory_space<vmem>>, %arg4: memref<2x32x128xf32, #tpu.memory_space<vmem>>, %arg5: memref<2x1x128xf32, #tpu.memory_space<vmem>>, %arg6: memref<8x16xf32, #tpu.memory_space<vmem>>) attributes {dimension_semantics = [#tpu.dimension_semantics<parallel>, #tpu.dimension_semantics<parallel>, #tpu.dimension_semantics<arbitrary>], iteration_bounds = array<i64: 2, 1, 1>, scalar_prefetch = 0 : i64, scratch_operands = 0 : i64, tpu.core_type = #tpu.core_type<tc>, window_params = [{transform_indices = @transform_0, window_bounds = array<i64: 8, 32>}, {transform_indices = @transform_1, window_bounds = array<i64: 2, 32, 128>}, {transform_indices = @transform_2, window_bounds = array<i64: 2, 1, 128>}, {transform_indices = @transform_3, window_bounds = array<i64: 8, 16>}]} {
    %c0 = arith.constant 0 : index
    %c0_0 = arith.constant 0 : index
    %0 = vector.load %arg3[%c0, %c0_0] : memref<8x32xf32, #tpu.memory_space<vmem>>, vector<8x32xf32>
    %c0_1 = arith.constant 0 : index
    %c0_2 = arith.constant 0 : index
    %c0_3 = arith.constant 0 : index
    %1 = vector.load %arg4[%c0_1, %c0_2, %c0_3] : memref<2x32x128xf32, #tpu.memory_space<vmem>>, vector<1x32x128xf32>
    %2 = vector.shape_cast %1 : vector<1x32x128xf32> to vector<32x128xf32>
    %cst = arith.constant dense<0.000000e+00> : vector<8x128xf32>
    %3 = tpu.matmul %0, %2, %cst {dimension_numbers = #tpu.dot_dimension_numbers<[1], [0], [0], [1], [0, 0, 1, 1], [], []>} : vector<8x32xf32>, vector<32x128xf32>, vector<8x128xf32> -> vector<8x128xf32>
    %c1 = arith.constant 1 : index
    %c0_4 = arith.constant 0 : index
    %c0_5 = arith.constant 0 : index
    %4 = vector.load %arg4[%c1, %c0_4, %c0_5] : memref<2x32x128xf32, #tpu.memory_space<vmem>>, vector<1x32x128xf32>
    %5 = vector.shape_cast %4 : vector<1x32x128xf32> to vector<32x128xf32>
    %cst_6 = arith.constant dense<0.000000e+00> : vector<8x128xf32>
    %6 = tpu.matmul %0, %5, %cst_6 {dimension_numbers = #tpu.dot_dimension_numbers<[1], [0], [0], [1], [0, 0, 1, 1], [], []>} : vector<8x32xf32>, vector<32x128xf32>, vector<8x128xf32> -> vector<8x128xf32>
    %c0_7 = arith.constant 0 : index
    %c0_8 = arith.constant 0 : index
    %c0_9 = arith.constant 0 : index
    %7 = vector.load %arg5[%c0_7, %c0_8, %c0_9] : memref<2x1x128xf32, #tpu.memory_space<vmem>>, vector<1x1x128xf32>
    %8 = vector.shape_cast %7 : vector<1x1x128xf32> to vector<1x128xf32>
    %9 = vector.broadcast %8 : vector<1x128xf32> to vector<8x128xf32>
    %10 = arith.addf %3, %9 : vector<8x128xf32>
    %c1_10 = arith.constant 1 : index
    %c0_11 = arith.constant 0 : index
    %c0_12 = arith.constant 0 : index
    %11 = vector.load %arg5[%c1_10, %c0_11, %c0_12] : memref<2x1x128xf32, #tpu.memory_space<vmem>>, vector<1x1x128xf32>
    %12 = vector.shape_cast %11 : vector<1x1x128xf32> to vector<1x128xf32>
    %13 = vector.broadcast %12 : vector<1x128xf32> to vector<8x128xf32>
    %14 = arith.addf %6, %13 : vector<8x128xf32>
    %cst_13 = arith.constant 0.000000e+00 : f32
    %15 = vector.broadcast %cst_13 : f32 to vector<8x128xf32>
    %16 = arith.cmpf oge, %10, %15 : vector<8x128xf32>
    %cst_14 = arith.constant 0.00999999977 : f32
    %17 = vector.broadcast %cst_14 : f32 to vector<8x128xf32>
    %18 = arith.mulf %17, %10 : vector<8x128xf32>
    %19 = arith.select %16, %10, %18 : vector<8x128xi1>, vector<8x128xf32>
    %cst_15 = arith.constant 0.000000e+00 : f32
    %20 = vector.broadcast %cst_15 : f32 to vector<8x128xf32>
    %21 = arith.cmpf ole, %14, %20 : vector<8x128xf32>
    %cst_16 = arith.constant 0.000000e+00 : f32
    %22 = vector.broadcast %cst_16 : f32 to vector<8x128xf32>
    %23 = arith.subf %22, %14 : vector<8x128xf32>
    %cst_17 = arith.constant 0.000000e+00 : f32
    %24 = vector.broadcast %cst_17 : f32 to vector<8x128xf32>
    %25 = arith.subf %24, %14 : vector<8x128xf32>
    %cst_18 = arith.constant 0.00999999977 : f32
    %26 = vector.broadcast %cst_18 : f32 to vector<8x128xf32>
    %27 = arith.mulf %26, %25 : vector<8x128xf32>
    %28 = arith.select %21, %23, %27 : vector<8x128xi1>, vector<8x128xf32>
    %29 = arith.subf %19, %28 : vector<8x128xf32>
    %30 = vector.extract_strided_slice %29 {offsets = [0, 0], sizes = [8, 16], strides = [1, 1]} : vector<8x128xf32> to vector<8x16xf32>
    %c0_19 = arith.constant 0 : index
    %c0_20 = arith.constant 0 : index
    %31 = vector.load %arg6[%c0_19, %c0_20] : memref<8x16xf32, #tpu.memory_space<vmem>>, vector<8x16xf32>
    tpu.vector_store %arg6[%c0_19, %c0_20], %30 {strides = array<i32>} : memref<8x16xf32, #tpu.memory_space<vmem>>, vector<8x16xf32>,
    return
  }
  func.func @transform_0(%arg0: i32, %arg1: i32, %arg2: i32) -> (i32, i32) {
    %c0_i32 = arith.constant 0 : i32
    return %arg0, %arg2 : i32, i32
  }
  func.func @transform_1(%arg0: i32, %arg1: i32, %arg2: i32) -> (i32, i32, i32) {
    %c0_i32 = arith.constant 0 : i32
    %c0_i32_0 = arith.constant 0 : i32
    return %c0_i32, %arg2, %arg1 : i32, i32, i32
  }
  func.func @transform_2(%arg0: i32, %arg1: i32, %arg2: i32) -> (i32, i32, i32) {
    %c0_i32 = arith.constant 0 : i32
    %c0_i32_0 = arith.constant 0 : i32
    %c0_i32_1 = arith.constant 0 : i32
    return %c0_i32, %c0_i32_0, %arg1 : i32, i32, i32
  }
  func.func @transform_3(%arg0: i32, %arg1: i32, %arg2: i32) -> (i32, i32) {
    %c0_i32 = arith.constant 0 : i32
    return %arg0, %arg1 : i32, i32
  }
}

</mosaic_0001>

<bundles_post_ra>
// kernel: tpu_custom_call.1
= control target key start
LH: loop header
LB: loop body
LE: loop exit
PB: predicated region body
PF: predicated region fallthrough
CT: control target
= control target key end

     0   :  { %8 = vsyncpa [#allocation3], 0  ;;  %s1095_s0 = inlined_call_operand.hbm [shape: f32[16,32], index: 0, kind: input, shape index: {}]   ;;  %s1096_s1 = inlined_call_operand.hbm [shape: f32[2,32,128], index: 1, kind: input, shape index: {}]   ;;  %s1097_s2 = inlined_call_operand.vmem [shape: f32[2,1,128], index: 2, kind: input, shape index: {}]   ;;  %s1098_s3 = inlined_call_operand.hbm [shape: f32[16,16], index: 3, kind: output, shape index: {}]  }
   0x1   :  { %10 = vsyncpa [#allocation3 + $0x1], 0 }
   0x2   :  { %11 = vsyncpa [#allocation6], 0 }
   0x3   :  { %12 = vsyncpa [#allocation4], 0 }
   0x4   :  { %14 = vsyncpa [#allocation4 + $0x1], 0  ;;  %s871_s12 = smov 0   ;;  %s873_s13 = smov 0  }
   0x5   :  { %s875_s14 = smov 0   ;;  %s877_s15 = smov 0  }
   0x6   :  { %s879_s16 = smov 0   ;;  %s881_s17 = smov 0  }
   0x7 LB: > { %s554_s18 = sadd.s32 4294967295, %s841_s17   ;;  %s555_s19 = sadd.s32 4294967294, %s841_s17   ;;  %s841_s17 = sphi %s881_s17, %s20_s17   ;;  %s837_s16 = sphi %s879_s16, %s1122_s16   ;;  %s833_s15 = sphi %s877_s15, %s1121_s15   ;;  %s829_s14 = sphi %s875_s14, %s1120_s14   ;;  %s825_s13 = sphi %s873_s13, %s1119_s13   ;;  %s821_s12 = sphi %s871_s12, %s1118_s12  }
   0x8   : > { %p61_p0 = scmp.ne.s32.totalorder %s825_s13, %s821_s12  ;;  %p905_p1 = scmp.eq.s32.totalorder %s554_s18, 0 }
   0x9   : > { %p909_p2 = scmp.eq.s32.totalorder %s554_s18, 1  ;;  %p147_p3 = scmp.eq.s32.totalorder %s555_s19, 1 }
   0xa   : > { %s1103_s20 = scalar_select %p905_p1, 1, 0 }
   0xb   : > { %s1104_s21 = scalar_select %p909_p2, 1, 0 }
   0xc   : > { %p915_p4 = por %p905_p1, %p61_p0  ;;  %p556_p5 = scmp.ge.s32.totalorder %s841_s17, 1 }
   0xd   : > { %p920_p6 = por %p147_p3, %p61_p0  ;;  %p154_p7 = scmp.lt.s32.totalorder %s841_s17, 3 }
   0xe   : > { %s1105_s22 = scalar_select %p915_p4, 1, 0 }
   0xf   : > { %s1106_s23 = scalar_select %p920_p6, 1, 0 }
  0x10   : > { %p925_p8 = pnand %p556_p5, %p154_p7  ;;  %s843_s25 = smov [#allocation5]  }
  0x11   : > { %s170_s26 = sshll.u32 %s843_s25, 4  ;;  %s39_s28 = sadd.s32 1, %s837_s16  ;;  %s171_s26 = int_to_ptr.vmem [resolvable:$true] %s170_s26 }
  0x12   : > { %s1107_s24 = scalar_select %p925_p8, 1, 0 }
  0x13   : > { %p627_p9 = pneg %p925_p8  ;;  %s697_s4 = scalar_lea.hbm %s1096_s1, 1024 }
  0x14   : > { %p698_p12 = scmp.ne.s32.totalorder %s1096_s1, %s697_s4  ;;  %p704_p5 = scmp.lt.u32.totalorder %s697_s4, %s1096_s1 }
  0x15   : > { %p934_p11 = pnand %p627_p9, %p905_p1 }
  0x17   : > { %p699_p13 = pneg %p934_p11 }
  0x19   : > { %p700_p0 = pnand %p699_p13, %p698_p12 }
  0x1b   : > { %p701_p3 = pneg %p700_p0 }
  0x1d   : > { %p706_p7 = pnand %p704_p5, %p701_p3 }
  0x1f   : > { %709 = shalt.err (!%p706_p7)
}
  0x20   : > { %s710_s9 = scalar_lea.vmem %s171_s26, 1024  ;;  %p718_p1 = scmp.lt.s32.totalorder %s171_s26, %s171_s26 }
  0x21   : > { %p711_p9 = scmp.ne.s32.totalorder %s171_s26, %s710_s9  ;;  %p719_p4 = scmp.lt.s32.totalorder %s710_s9, %s710_s9 }
  0x23   : > { %p713_p10 = pnand %p711_p9, %p699_p13  ;;  %p720_p8 = por %p719_p4, %p718_p1 }
  0x25   : > { %p714_p6 = pneg %p713_p10 }
  0x27   : > { %p721_p2 = pnand %p720_p8, %p714_p6 }
  0x29   : > { %724 = shalt.err (!%p721_p2)
}
  0x2a   : > { %s844_s10 = smov 128   ;;  %s845_s11 = smov 8  }
  0x2b   : > { %630 = dma.hbm_to_vmem [thread:$0]  (!%p934_p11), %s1096_s1, 1024, %s171_s26, [#allocation6], %s844_s10, %s844_s10, %s845_s11  }
  0x2c   : > { %p41_p1 = scmp.ge.s32.totalorder %s39_s28, 2  ;;  %s48_s25 = sadd.s32 1, %s829_s14 }
  0x2d   : > { %p55_p2 = scmp.ne.s32.totalorder %s829_s14, %s825_s13  ;;  %p56_p4 = scmp.eq.s32.totalorder %s841_s17, 0 }
  0x2e   : > { %s1124_s28 = smov (%p41_p1, %s39_s28), 0  ;;  %p1110_p8 = scmp.ne.s32.totalorder %s1104_s21, 0 }
  0x2f   : > { %p961_p6 = por %p56_p4, %p55_p2  ;;  %s43_s27 = ssub.s32 %s837_s16, %s1124_s28 }
  0x30   : > { %p967_p10 = por %p1110_p8, %p55_p2  ;;  %p640_p12 = scmp.lt.s32.totalorder %s841_s17, 2 }
  0x31   : > { %p46_p11 = scmp.eq.s32.totalorder %s43_s27, 0  ;;  %s190_s26 = sand.u32 1, %s829_s14  }
  0x32   : > { %s560_s4 = sshll.u32 %s190_s26, 3  ;;  %s561_s6 = sshll.u32 %s837_s16, 7 }
  0x33   : > { %s976_s5 = scalar_select %p46_p11, %s829_s14, %s48_s25  }
  0x34   : > { %s982_s9 = scalar_lea.hbm %s1095_s0, %s561_s6  ;;  %s194_s21 = scalar_lea.vmem [#allocation2], %s560_s4 }
  0x35   : > { %s202_s10 = sshll.u32 %s194_s21, 4  ;;  %p988_p13 = pnand %p640_p12, %p961_p6  ;;  %s984_s10 = int_to_ptr.vmem [resolvable:$true] %s202_s10 }
  0x36   : > { %s191_s18 = scalar_lea.sflag [#allocation3], %s190_s26  ;;  %s725_s19 = scalar_lea.hbm %s982_s9, 128 }
  0x37   : > { %p726_p0 = scmp.ne.s32.totalorder %s982_s9, %s725_s19  ;;  %p727_p3 = pneg %p988_p13 }
  0x38   : > { %s730_s4 = scalar_lea.hbm %s1095_s0, 256  ;;  %p731_p9 = scmp.lt.u32.totalorder %s982_s9, %s1095_s0 }
  0x39   : > { %p728_p5 = pnand %p727_p3, %p726_p0  ;;  %p732_p1 = scmp.lt.u32.totalorder %s730_s4, %s725_s19 }
  0x3a   : > { %p734_p4 = scmp.lt.u32.totalorder %s725_s19, %s982_s9 }
  0x3b   : > { %p729_p7 = pneg %p728_p5  ;;  %p733_p2 = por %p732_p1, %p731_p9 }
  0x3d   : > { %p735_p6 = por %p734_p4, %p733_p2 }
  0x3f   : > { %p736_p8 = pnand %p735_p6, %p729_p7 }
  0x41   : > { %739 = shalt.err (!%p736_p8)
}
  0x42   : > { %s740_s26 = scalar_lea.vmem %s984_s10, 128  ;;  %s846_s7 = smov [#allocation2]  }
  0x43   : > { %p741_p12 = scmp.ne.s32.totalorder %s984_s10, %s740_s26  ;;  %s745_s8 = sshll.u32 %s846_s7, 4  ;;  %s746_s8 = int_to_ptr.vmem [resolvable:$false] %s745_s8 }
  0x44   : > { %s747_s21 = scalar_lea.vmem %s746_s8, 256  ;;  %p748_p5 = scmp.lt.s32.totalorder %s984_s10, %s746_s8 }
  0x45   : > { %p743_p11 = pnand %p741_p12, %p727_p3  ;;  %p749_p9 = scmp.lt.s32.totalorder %s747_s21, %s740_s26 }
  0x47   : > { %p744_p0 = pneg %p743_p11  ;;  %p750_p1 = por %p749_p9, %p748_p5 }
  0x49   : > { %p751_p2 = pnand %p750_p1, %p744_p0 }
  0x4b   : > { %754 = shalt.err (!%p751_p2)
}
  0x4c   : > { %634 = dma.hbm_to_vmem [thread:$0]  (!%p988_p13), %s982_s9, 128, %s984_s10, %s191_s18  }
  0x4d   : > { %p1113_p7 = scmp.ne.s32.totalorder %s1107_s24, 0 }
  0x4e   : > { %s1020_s19 = sand.u32 (!%p1113_p7), 1, %s825_s13   ;;  %p1114_p3 = scmp.ne.s32.totalorder (!%p1113_p7), %s1105_s22, 0 }
  0x4f   : > { %211 = sbr.rel (%p1113_p7) target bundleno = 337 (0x151), region = 32  ;;  %s563_s25 = sshll.u32 (!%p1113_p7), %s1020_s19, 3 }
  0x50   : > { %s214_s27 = scalar_lea.sflag (!%p1113_p7), [#allocation3], %s1020_s19  ;;  %s217_s4 = scalar_lea.vmem (!%p1113_p7), [#allocation2], %s563_s25 }
  0x56   : > { %808 = dma.done.wait (%p1114_p3), %s214_s27, 128  }
  0x57   : > { %810 = vsyncadd (%p1114_p3), %s214_s27, 4294967168  ;;  %p1115_p13 = scmp.ne.s32.totalorder %s1103_s20, 0 }
  0x59   : > { %812 = dma.done.wait (%p1115_p13), [#allocation6], 1024  }
  0x5a   : > { %814 = vsyncadd (%p1115_p13), [#allocation6], 4294966272  ;;  %v847_v0 = vmov 0.0|0.0   ;;  %vm848_vm0 = vmmov 0   ;;  %v849_v1 = vmov 0.0   ;;  %v252_v2 = vld [vmem:[#allocation5] sm:$0xff] }
  0x5b   : > { %607 = vmatprep.subr.bf16.mxu0 %v847_v0  ;;  %613 = vmatprep.subr.bf16.mxu1 %v847_v0  ;;  %v253_v3 = vld [vmem:[#allocation5 + $0x8] sm:$0xff]  ;;  %v257_v4 = vld [vmem:[#allocation5 + $0x20] sm:$0xff]  ;;  %v254_v7 = vld [vmem:[#allocation5 + $0x10] sm:$0xff]  ;;  %vm268_vm1 = vcmask 261120   ;;  %s572_s10 = sshll.u32 %s833_s15, 7  ;;  %s246_s11 = scalar_lea.vmem [#allocation7], %s563_s25 }
  0x5c   : > { %593 = vmatprep.mubr.msk.f32.mxu0 %vm848_vm0, %v849_v1  ;;  %604 = vmatprep.mubr.msk.f32.mxu1 %vm848_vm0, %v849_v1  ;;  %v608_v5 = vpack.c.bf16 %v253_v3, %v252_v2  ;;  %v258_v6 = vld [vmem:[#allocation5 + $0x28] sm:$0xff]  ;;  %v255_v8 = vld [vmem:[#allocation5 + $0x18] sm:$0xff]  ;;  %v259_v10 = vld [vmem:[#allocation5 + $0x30] sm:$0xff]  ;;  %s445_s18 = sshll.u32 %s246_s11, 4  ;;  %vm428_vm4 = vcmask 130048   ;;  %s1046_s26 = scalar_lea.hbm %s1098_s3, %s572_s10  ;;  %s1048_s18 = int_to_ptr.vmem [resolvable:$true] %s445_s18 }
  0x5d   : > { %v614_v9 = vpack.c.bf16 %v258_v6, %v257_v4  ;;  %v260_v11 = vld [vmem:[#allocation5 + $0x38] sm:$0xff]  ;;  %v611_v12 = vpack.c.bf16 %v255_v8, %v254_v7  ;;  %v566_v15 = vld [vmem:[%s1097_s2] ss:$0 sm:$0xff]  ;;  %v569_v16 = vld [vmem:[%s1097_s2 + $0x1] ss:$0 sm:$0xff]  ;;  %s431_s15 = scalar_lea.sflag [#allocation4], %s1020_s19 }
  0x5e   : > { %609 = vmatpush3.bf16.msra.mxu0 %v608_v5  ;;  %v617_v13 = vpack.c.bf16 %v260_v11, %v259_v10  ;;  %v251_v14 = vld [vmem:[%s217_s4] sm:$0xff]  ;;  %s755_s7 = scalar_lea.vmem %s1048_s18, 128  ;;  %s850_s8 = smov [#allocation7]  }
  0x5f   : > { %615 = vmatpush3.bf16.msra.mxu1 %v614_v9  ;;  %610 = vmatprep.subr.bf16.mxu0 %v847_v0  ;;  %p756_p4 = scmp.ne.s32.totalorder %s1048_s18, %s755_s7  ;;  %s759_s21 = sshll.u32 %s850_s8, 4  ;;  %s760_s21 = int_to_ptr.vmem [resolvable:$false] %s759_s21 }
  0x60   : > { %616 = vmatprep.subr.bf16.mxu1 %v847_v0  ;;  %s761_s25 = scalar_lea.vmem %s760_s21, 256  ;;  %p762_p12 = scmp.lt.s32.totalorder %s1048_s18, %s760_s21 }
  0x61   : > { %p757_p6 = pnand %p756_p4, %p967_p10  ;;  %p763_p11 = scmp.lt.s32.totalorder %s761_s25, %s755_s7 }
  0x62   : > { %612 = vmatpush3.bf16.msra.mxu0 %v611_v12 }
  0x63   : > { %618 = vmatpush3.bf16.msra.mxu1 %v617_v13  ;;  %p758_p8 = pneg %p757_p6  ;;  %p764_p0 = por %p763_p11, %p762_p12 }
  0x65   : > { %594 = vmatmul.mubr.msk.f32.vlgmr.msra.gmra.mrb[0].mxu0 %vm268_vm1, %v251_v14  ;;  %p765_p5 = pnand %p764_p0, %p758_p8 }
  0x66   : > { %605 = vmatmul.mubr.msk.f32.vlgmr.msra.gmra.mrb[0].mxu1 %vm268_vm1, %v251_v14 }
 0x138   : > { %v338_v17 = vpop.f32.mrb[0].mxu0 }
 0x139   : > { %v339_v18 = vadd.f32 %v566_v15, %v338_v17  ;;  %v416_v19 = vpop.f32.mrb[0].mxu1  ;;  %v595_v20 = vpop.f32.mrb[1].mxu0 }
 0x13a   : > { %v417_v21 = vadd.f32 %v569_v16, %v416_v19  ;;  %v606_v22 = vpop.f32.mrb[1].mxu1 }
 0x13b   : > { %v421_v23 = vmul.f32 0.01, %v339_v18  ;;  %vm420_vm2 = vcmp.ge.f32.partialorder %v339_v18, 0.0 }
 0x13c   : > { %v424_v24 = vsub.f32 0.0, %v417_v21  ;;  %vm423_vm3 = vcmp.le.f32.partialorder %v417_v21, 0.0 }
 0x13d   : > { %v422_v26 = vsel %vm420_vm2, %v339_v18, %v421_v23 }
 0x13e   : > { %v425_v25 = vmul.f32 0.01, %v424_v24 }
 0x140   : > { %v426_v27 = vsel %vm423_vm3, %v424_v24, %v425_v25 }
 0x141   : > { %v427_v28 = vsub.f32 %v422_v26, %v426_v27 }
 0x143   : > { %429 = vst.msk [vmem:[%s246_s11] sm:$0xff] %vm428_vm4, %v427_v28 }
 0x144   : > { %768 = shalt.err (!%p765_p5)
}
 0x145   : > { %s769_s19 = scalar_lea.hbm %s1046_s26, 128  ;;  %s773_s20 = scalar_lea.hbm %s1098_s3, 256 }
 0x146   : > { %p770_p9 = scmp.ne.s32.totalorder %s1046_s26, %s769_s19  ;;  %p774_p7 = scmp.lt.u32.totalorder %s1046_s26, %s1098_s3 }
 0x147   : > { %p775_p3 = scmp.lt.u32.totalorder %s773_s20, %s769_s19  ;;  %p777_p4 = scmp.lt.u32.totalorder %s769_s19, %s1046_s26 }
 0x148   : > { %p771_p1 = pnand %p770_p9, %p967_p10 }
 0x149   : > { %p776_p13 = por %p775_p3, %p774_p7 }
 0x14a   : > { %p772_p2 = pneg %p771_p1 }
 0x14b   : > { %p778_p6 = por %p777_p4, %p776_p13 }
 0x14d   : > { %p779_p8 = pnand %p778_p6, %p772_p2 }
 0x14f   : > { %782 = shalt.err (!%p779_p8)
}
 0x150   : > { %625 = dma.vmem_to_hbm [thread:$0]  (%p967_p10), %s1048_s18, 128, %s1046_s26, %s431_s15  }
 0x151 PF: > { %s457_s9 = sand.u32 1, %s821_s12   ;;  %p1116_p12 = scmp.ne.s32.totalorder %s1106_s23, 0 }
 0x152   : > { %p1117_p11 = scmp.ge.s32.totalorder %s841_s17, 2  ;;  %s458_s10 = scalar_lea.sflag [#allocation4], %s457_s9 }
 0x154   : > { %p636_p0 = pnand %p1117_p11, %p1116_p12 }
 0x156   : > { %816 = dma.done.wait (!%p636_p0), %s458_s10, 128  }
 0x157   : > { %818 = vsyncadd (!%p636_p0), %s458_s10, 4294967168  ;;  %s20_s17 = sadd.s32 1, %s841_s17   ;;  %s1118_s12 = smov %s825_s13 }
 0x158   : > { %p17_p5 = scmp.ge.s32.totalorder %s20_s17, 4   ;;  %s1119_s13 = smov %s829_s14 }
 0x159   : > { %s1120_s14 = smov %s976_s5  ;;  %s1121_s15 = smov %s837_s16 }
 0x15a   : > { %s1122_s16 = smov %s1124_s28  ;;  %19 = sbr.rel (!%p17_p5) target bundleno = 7 (0x7), region = 87 }
 0x161   :  { %463 = vsyncpa [#allocation3], 1 }
 0x162   :  { %465 = vsyncpa [#allocation3 + $0x1], 1 }
 0x163   :  { %466 = vsyncpa [#allocation6], 1 }
 0x164   :  { %467 = vsyncpa [#allocation4], 1 }
 0x165   :  { %469 = vsyncpa [#allocation4 + $0x1], 1 }

// kernel: tpu_custom_call.1
= control target key start
LH: loop header
LB: loop body
LE: loop exit
PB: predicated region body
PF: predicated region fallthrough
CT: control target
= control target key end

     0   :  { %8 = vsyncpa [#allocation3], 0  ;;  %s1095_s0 = inlined_call_operand.hbm [shape: f32[16,32], index: 0, kind: input, shape index: {}]   ;;  %s1096_s1 = inlined_call_operand.hbm [shape: f32[2,32,128], index: 1, kind: input, shape index: {}]   ;;  %s1097_s2 = inlined_call_operand.vmem [shape: f32[2,1,128], index: 2, kind: input, shape index: {}]   ;;  %s1098_s3 = inlined_call_operand.hbm [shape: f32[16,16], index: 3, kind: output, shape index: {}]  }
   0x1   :  { %10 = vsyncpa [#allocation3 + $0x1], 0 }
   0x2   :  { %11 = vsyncpa [#allocation6], 0 }
   0x3   :  { %12 = vsyncpa [#allocation4], 0 }
   0x4   :  { %14 = vsyncpa [#allocation4 + $0x1], 0  ;;  %s871_s12 = smov 0   ;;  %s873_s13 = smov 0  }
   0x5   :  { %s875_s14 = smov 0   ;;  %s877_s15 = smov 0  }
   0x6   :  { %s879_s16 = smov 0   ;;  %s881_s17 = smov 0  }
   0x7 LB: > { %s554_s18 = sadd.s32 4294967295, %s841_s17   ;;  %s555_s19 = sadd.s32 4294967294, %s841_s17   ;;  %s841_s17 = sphi %s881_s17, %s20_s17   ;;  %s837_s16 = sphi %s879_s16, %s1122_s16   ;;  %s833_s15 = sphi %s877_s15, %s1121_s15   ;;  %s829_s14 = sphi %s875_s14, %s1120_s14   ;;  %s825_s13 = sphi %s873_s13, %s1119_s13   ;;  %s821_s12 = sphi %s871_s12, %s1118_s12  }
   0x8   : > { %p61_p0 = scmp.ne.s32.totalorder %s825_s13, %s821_s12  ;;  %p905_p1 = scmp.eq.s32.totalorder %s554_s18, 0 }
   0x9   : > { %p909_p2 = scmp.eq.s32.totalorder %s554_s18, 1  ;;  %p147_p3 = scmp.eq.s32.totalorder %s555_s19, 1 }
   0xa   : > { %s1103_s20 = scalar_select %p905_p1, 1, 0 }
   0xb   : > { %s1104_s21 = scalar_select %p909_p2, 1, 0 }
   0xc   : > { %p915_p4 = por %p905_p1, %p61_p0  ;;  %p556_p5 = scmp.ge.s32.totalorder %s841_s17, 1 }
   0xd   : > { %p920_p6 = por %p147_p3, %p61_p0  ;;  %p154_p7 = scmp.lt.s32.totalorder %s841_s17, 3 }
   0xe   : > { %s1105_s22 = scalar_select %p915_p4, 1, 0 }
   0xf   : > { %s1106_s23 = scalar_select %p920_p6, 1, 0 }
  0x10   : > { %p925_p8 = pnand %p556_p5, %p154_p7  ;;  %s843_s25 = smov [#allocation5]  }
  0x11   : > { %s170_s26 = sshll.u32 %s843_s25, 4  ;;  %s39_s28 = sadd.s32 1, %s837_s16  ;;  %s171_s26 = int_to_ptr.vmem [resolvable:$true] %s170_s26 }
  0x12   : > { %s1107_s24 = scalar_select %p925_p8, 1, 0 }
  0x13   : > { %p627_p9 = pneg %p925_p8  ;;  %s697_s4 = scalar_lea.hbm %s1096_s1, 1024 }
  0x14   : > { %p698_p12 = scmp.ne.s32.totalorder %s1096_s1, %s697_s4  ;;  %p704_p5 = scmp.lt.u32.totalorder %s697_s4, %s1096_s1 }
  0x15   : > { %p934_p11 = pnand %p627_p9, %p905_p1 }
  0x17   : > { %p699_p13 = pneg %p934_p11 }
  0x19   : > { %p700_p0 = pnand %p699_p13, %p698_p12 }
  0x1b   : > { %p701_p3 = pneg %p700_p0 }
  0x1d   : > { %p706_p7 = pnand %p704_p5, %p701_p3 }
  0x1f   : > { %709 = shalt.err (!%p706_p7)
}
  0x20   : > { %s710_s9 = scalar_lea.vmem %s171_s26, 1024  ;;  %p718_p1 = scmp.lt.s32.totalorder %s171_s26, %s171_s26 }
  0x21   : > { %p711_p9 = scmp.ne.s32.totalorder %s171_s26, %s710_s9  ;;  %p719_p4 = scmp.lt.s32.totalorder %s710_s9, %s710_s9 }
  0x23   : > { %p713_p10 = pnand %p711_p9, %p699_p13  ;;  %p720_p8 = por %p719_p4, %p718_p1 }
  0x25   : > { %p714_p6 = pneg %p713_p10 }
  0x27   : > { %p721_p2 = pnand %p720_p8, %p714_p6 }
  0x29   : > { %724 = shalt.err (!%p721_p2)
}
  0x2a   : > { %s844_s10 = smov 128   ;;  %s845_s11 = smov 8  }
  0x2b   : > { %630 = dma.hbm_to_vmem [thread:$0]  (!%p934_p11), %s1096_s1, 1024, %s171_s26, [#allocation6], %s844_s10, %s844_s10, %s845_s11  }
  0x2c   : > { %p41_p1 = scmp.ge.s32.totalorder %s39_s28, 2  ;;  %s48_s25 = sadd.s32 1, %s829_s14 }
  0x2d   : > { %p55_p2 = scmp.ne.s32.totalorder %s829_s14, %s825_s13  ;;  %p56_p4 = scmp.eq.s32.totalorder %s841_s17, 0 }
  0x2e   : > { %s1124_s28 = smov (%p41_p1, %s39_s28), 0  ;;  %p1110_p8 = scmp.ne.s32.totalorder %s1104_s21, 0 }
  0x2f   : > { %p961_p6 = por %p56_p4, %p55_p2  ;;  %s43_s27 = ssub.s32 %s837_s16, %s1124_s28 }
  0x30   : > { %p967_p10 = por %p1110_p8, %p55_p2  ;;  %p640_p12 = scmp.lt.s32.totalorder %s841_s17, 2 }
  0x31   : > { %p46_p11 = scmp.eq.s32.totalorder %s43_s27, 0  ;;  %s190_s26 = sand.u32 1, %s829_s14  }
  0x32   : > { %s560_s4 = sshll.u32 %s190_s26, 3  ;;  %s561_s6 = sshll.u32 %s837_s16, 7 }
  0x33   : > { %s976_s5 = scalar_select %p46_p11, %s829_s14, %s48_s25  }
  0x34   : > { %s982_s9 = scalar_lea.hbm %s1095_s0, %s561_s6  ;;  %s194_s21 = scalar_lea.vmem [#allocation2], %s560_s4 }
  0x35   : > { %s202_s10 = sshll.u32 %s194_s21, 4  ;;  %p988_p13 = pnand %p640_p12, %p961_p6  ;;  %s984_s10 = int_to_ptr.vmem [resolvable:$true] %s202_s10 }
  0x36   : > { %s191_s18 = scalar_lea.sflag [#allocation3], %s190_s26  ;;  %s725_s19 = scalar_lea.hbm %s982_s9, 128 }
  0x37   : > { %p726_p0 = scmp.ne.s32.totalorder %s982_s9, %s725_s19  ;;  %p727_p3 = pneg %p988_p13 }
  0x38   : > { %s730_s4 = scalar_lea.hbm %s1095_s0, 256  ;;  %p731_p9 = scmp.lt.u32.totalorder %s982_s9, %s1095_s0 }
  0x39   : > { %p728_p5 = pnand %p727_p3, %p726_p0  ;;  %p732_p1 = scmp.lt.u32.totalorder %s730_s4, %s725_s19 }
  0x3a   : > { %p734_p4 = scmp.lt.u32.totalorder %s725_s19, %s982_s9 }
  0x3b   : > { %p729_p7 = pneg %p728_p5  ;;  %p733_p2 = por %p732_p1, %p731_p9 }
  0x3d   : > { %p735_p6 = por %p734_p4, %p733_p2 }
  0x3f   : > { %p736_p8 = pnand %p735_p6, %p729_p7 }
  0x41   : > { %739 = shalt.err (!%p736_p8)
}
  0x42   : > { %s740_s26 = scalar_lea.vmem %s984_s10, 128  ;;  %s846_s7 = smov [#allocation2]  }
  0x43   : > { %p741_p12 = scmp.ne.s32.totalorder %s984_s10, %s740_s26  ;;  %s745_s8 = sshll.u32 %s846_s7, 4  ;;  %s746_s8 = int_to_ptr.vmem [resolvable:$false] %s745_s8 }
  0x44   : > { %s747_s21 = scalar_lea.vmem %s746_s8, 256  ;;  %p748_p5 = scmp.lt.s32.totalorder %s984_s10, %s746_s8 }
  0x45   : > { %p743_p11 = pnand %p741_p12, %p727_p3  ;;  %p749_p9 = scmp.lt.s32.totalorder %s747_s21, %s740_s26 }
  0x47   : > { %p744_p0 = pneg %p743_p11  ;;  %p750_p1 = por %p749_p9, %p748_p5 }
  0x49   : > { %p751_p2 = pnand %p750_p1, %p744_p0 }
  0x4b   : > { %754 = shalt.err (!%p751_p2)
}
  0x4c   : > { %634 = dma.hbm_to_vmem [thread:$0]  (!%p988_p13), %s982_s9, 128, %s984_s10, %s191_s18  }
  0x4d   : > { %p1113_p7 = scmp.ne.s32.totalorder %s1107_s24, 0 }
  0x4e   : > { %s1020_s19 = sand.u32 (!%p1113_p7), 1, %s825_s13   ;;  %p1114_p3 = scmp.ne.s32.totalorder (!%p1113_p7), %s1105_s22, 0 }
  0x4f   : > { %211 = sbr.rel (%p1113_p7) target bundleno = 337 (0x151), region = 32  ;;  %s563_s25 = sshll.u32 (!%p1113_p7), %s1020_s19, 3 }
  0x50   : > { %s214_s27 = scalar_lea.sflag (!%p1113_p7), [#allocation3], %s1020_s19  ;;  %s217_s4 = scalar_lea.vmem (!%p1113_p7), [#allocation2], %s563_s25 }
  0x56   : > { %808 = dma.done.wait (%p1114_p3), %s214_s27, 128  }
  0x57   : > { %810 = vsyncadd (%p1114_p3), %s214_s27, 4294967168  ;;  %p1115_p13 = scmp.ne.s32.totalorder %s1103_s20, 0 }
  0x59   : > { %812 = dma.done.wait (%p1115_p13), [#allocation6], 1024  }
  0x5a   : > { %814 = vsyncadd (%p1115_p13), [#allocation6], 4294966272  ;;  %v847_v0 = vmov 0.0|0.0   ;;  %vm848_vm0 = vmmov 0   ;;  %v849_v1 = vmov 0.0   ;;  %v252_v2 = vld [vmem:[#allocation5] sm:$0xff] }
  0x5b   : > { %607 = vmatprep.subr.bf16.mxu0 %v847_v0  ;;  %613 = vmatprep.subr.bf16.mxu1 %v847_v0  ;;  %v253_v3 = vld [vmem:[#allocation5 + $0x8] sm:$0xff]  ;;  %v257_v4 = vld [vmem:[#allocation5 + $0x20] sm:$0xff]  ;;  %v254_v7 = vld [vmem:[#allocation5 + $0x10] sm:$0xff]  ;;  %vm268_vm1 = vcmask 261120   ;;  %s572_s10 = sshll.u32 %s833_s15, 7  ;;  %s246_s11 = scalar_lea.vmem [#allocation7], %s563_s25 }
  0x5c   : > { %593 = vmatprep.mubr.msk.f32.mxu0 %vm848_vm0, %v849_v1  ;;  %604 = vmatprep.mubr.msk.f32.mxu1 %vm848_vm0, %v849_v1  ;;  %v608_v5 = vpack.c.bf16 %v253_v3, %v252_v2  ;;  %v258_v6 = vld [vmem:[#allocation5 + $0x28] sm:$0xff]  ;;  %v255_v8 = vld [vmem:[#allocation5 + $0x18] sm:$0xff]  ;;  %v259_v10 = vld [vmem:[#allocation5 + $0x30] sm:$0xff]  ;;  %s445_s18 = sshll.u32 %s246_s11, 4  ;;  %vm428_vm4 = vcmask 130048   ;;  %s1046_s26 = scalar_lea.hbm %s1098_s3, %s572_s10  ;;  %s1048_s18 = int_to_ptr.vmem [resolvable:$true] %s445_s18 }
  0x5d   : > { %v614_v9 = vpack.c.bf16 %v258_v6, %v257_v4  ;;  %v260_v11 = vld [vmem:[#allocation5 + $0x38] sm:$0xff]  ;;  %v611_v12 = vpack.c.bf16 %v255_v8, %v254_v7  ;;  %v566_v15 = vld [vmem:[%s1097_s2] ss:$0 sm:$0xff]  ;;  %v569_v16 = vld [vmem:[%s1097_s2 + $0x1] ss:$0 sm:$0xff]  ;;  %s431_s15 = scalar_lea.sflag [#allocation4], %s1020_s19 }
  0x5e   : > { %609 = vmatpush3.bf16.msra.mxu0 %v608_v5  ;;  %v617_v13 = vpack.c.bf16 %v260_v11, %v259_v10  ;;  %v251_v14 = vld [vmem:[%s217_s4] sm:$0xff]  ;;  %s755_s7 = scalar_lea.vmem %s1048_s18, 128  ;;  %s850_s8 = smov [#allocation7]  }
  0x5f   : > { %615 = vmatpush3.bf16.msra.mxu1 %v614_v9  ;;  %610 = vmatprep.subr.bf16.mxu0 %v847_v0  ;;  %p756_p4 = scmp.ne.s32.totalorder %s1048_s18, %s755_s7  ;;  %s759_s21 = sshll.u32 %s850_s8, 4  ;;  %s760_s21 = int_to_ptr.vmem [resolvable:$false] %s759_s21 }
  0x60   : > { %616 = vmatprep.subr.bf16.mxu1 %v847_v0  ;;  %s761_s25 = scalar_lea.vmem %s760_s21, 256  ;;  %p762_p12 = scmp.lt.s32.totalorder %s1048_s18, %s760_s21 }
  0x61   : > { %p757_p6 = pnand %p756_p4, %p967_p10  ;;  %p763_p11 = scmp.lt.s32.totalorder %s761_s25, %s755_s7 }
  0x62   : > { %612 = vmatpush3.bf16.msra.mxu0 %v611_v12 }
  0x63   : > { %618 = vmatpush3.bf16.msra.mxu1 %v617_v13  ;;  %p758_p8 = pneg %p757_p6  ;;  %p764_p0 = por %p763_p11, %p762_p12 }
  0x65   : > { %594 = vmatmul.mubr.msk.f32.vlgmr.msra.gmra.mrb[0].mxu0 %vm268_vm1, %v251_v14  ;;  %p765_p5 = pnand %p764_p0, %p758_p8 }
  0x66   : > { %605 = vmatmul.mubr.msk.f32.vlgmr.msra.gmra.mrb[0].mxu1 %vm268_vm1, %v251_v14 }
 0x138   : > { %v338_v17 = vpop.f32.mrb[0].mxu0 }
 0x139   : > { %v339_v18 = vadd.f32 %v566_v15, %v338_v17  ;;  %v416_v19 = vpop.f32.mrb[0].mxu1  ;;  %v595_v20 = vpop.f32.mrb[1].mxu0 }
 0x13a   : > { %v417_v21 = vadd.f32 %v569_v16, %v416_v19  ;;  %v606_v22 = vpop.f32.mrb[1].mxu1 }
 0x13b   : > { %v421_v23 = vmul.f32 0.01, %v339_v18  ;;  %vm420_vm2 = vcmp.ge.f32.partialorder %v339_v18, 0.0 }
 0x13c   : > { %v424_v24 = vsub.f32 0.0, %v417_v21  ;;  %vm423_vm3 = vcmp.le.f32.partialorder %v417_v21, 0.0 }
 0x13d   : > { %v422_v26 = vsel %vm420_vm2, %v339_v18, %v421_v23 }
 0x13e   : > { %v425_v25 = vmul.f32 0.01, %v424_v24 }
 0x140   : > { %v426_v27 = vsel %vm423_vm3, %v424_v24, %v425_v25 }
 0x141   : > { %v427_v28 = vsub.f32 %v422_v26, %v426_v27 }
 0x143   : > { %429 = vst.msk [vmem:[%s246_s11] sm:$0xff] %vm428_vm4, %v427_v28 }
 0x144   : > { %768 = shalt.err (!%p765_p5)
}
 0x145   : > { %s769_s19 = scalar_lea.hbm %s1046_s26, 128  ;;  %s773_s20 = scalar_lea.hbm %s1098_s3, 256 }
 0x146   : > { %p770_p9 = scmp.ne.s32.totalorder %s1046_s26, %s769_s19  ;;  %p774_p7 = scmp.lt.u32.totalorder %s1046_s26, %s1098_s3 }
 0x147   : > { %p775_p3 = scmp.lt.u32.totalorder %s773_s20, %s769_s19  ;;  %p777_p4 = scmp.lt.u32.totalorder %s769_s19, %s1046_s26 }
 0x148   : > { %p771_p1 = pnand %p770_p9, %p967_p10 }
 0x149   : > { %p776_p13 = por %p775_p3, %p774_p7 }
 0x14a   : > { %p772_p2 = pneg %p771_p1 }
 0x14b   : > { %p778_p6 = por %p777_p4, %p776_p13 }
 0x14d   : > { %p779_p8 = pnand %p778_p6, %p772_p2 }
 0x14f   : > { %782 = shalt.err (!%p779_p8)
}
 0x150   : > { %625 = dma.vmem_to_hbm [thread:$0]  (%p967_p10), %s1048_s18, 128, %s1046_s26, %s431_s15  }
 0x151 PF: > { %s457_s9 = sand.u32 1, %s821_s12   ;;  %p1116_p12 = scmp.ne.s32.totalorder %s1106_s23, 0 }
 0x152   : > { %p1117_p11 = scmp.ge.s32.totalorder %s841_s17, 2  ;;  %s458_s10 = scalar_lea.sflag [#allocation4], %s457_s9 }
 0x154   : > { %p636_p0 = pnand %p1117_p11, %p1116_p12 }
 0x156   : > { %816 = dma.done.wait (!%p636_p0), %s458_s10, 128  }
 0x157   : > { %818 = vsyncadd (!%p636_p0), %s458_s10, 4294967168  ;;  %s20_s17 = sadd.s32 1, %s841_s17   ;;  %s1118_s12 = smov %s825_s13 }
 0x158   : > { %p17_p5 = scmp.ge.s32.totalorder %s20_s17, 4   ;;  %s1119_s13 = smov %s829_s14 }
 0x159   : > { %s1120_s14 = smov %s976_s5  ;;  %s1121_s15 = smov %s837_s16 }
 0x15a   : > { %s1122_s16 = smov %s1124_s28  ;;  %19 = sbr.rel (!%p17_p5) target bundleno = 7 (0x7), region = 87 }
 0x161   :  { %463 = vsyncpa [#allocation3], 1 }
 0x162   :  { %465 = vsyncpa [#allocation3 + $0x1], 1 }
 0x163   :  { %466 = vsyncpa [#allocation6], 1 }
 0x164   :  { %467 = vsyncpa [#allocation4], 1 }
 0x165   :  { %469 = vsyncpa [#allocation4 + $0x1], 1 }

</bundles_post_ra>
